<compile_context>
chip_gen: v6e
topology: v6e:2x2x1
jax: 0.10.0
libtpu: 0.0.40
codegen_flags: <defaults>
</compile_context>

<pallas_src>
import jax
import jax.numpy as jnp
from jax.experimental import pallas as pl
from jax.experimental.pallas import tpu as pltpu

_EPS = 1e-5
_LANE = 128
_VMEM_LIMIT = 32 * 1024 * 1024


def _round_up(d, m=_LANE):
    return max(m, ((d + m - 1) // m) * m)


def _pad_cols(a, cols):
    return jnp.pad(a, [(0, 0)] * (a.ndim - 1) + [(0, cols - a.shape[-1])])


def _pad2(a, rows, cols):
    return jnp.pad(a, ((0, rows - a.shape[0]), (0, cols - a.shape[1])))


def _bn_scale_shift(x, gamma, beta):
    """BatchNorm1d (training) reduced to per-column scale/shift: bn(h)=h*s+t."""
    mean = jnp.mean(x, axis=0, keepdims=True)
    var = jnp.var(x, axis=0, keepdims=True)          # biased, like PyTorch BN
    s = gamma * jax.lax.rsqrt(var + _EPS)
    t = beta - mean * s
    return s, t


# --------------------------------------------------------------------------- #
# Kernel 1: agg = adj @ x   (row-tiled, K-reduction, bf16 MXU, f32 accumulate) #
# --------------------------------------------------------------------------- #
def _spmm_kernel(adj_ref, x_ref, out_ref, acc_ref):
    @pl.when(pl.program_id(1) == 0)
    def _():
        acc_ref[...] = jnp.zeros_like(acc_ref)

    acc_ref[...] += jnp.dot(adj_ref[...], x_ref[...],
                            preferred_element_type=jnp.float32)

    @pl.when(pl.program_id(1) == pl.num_programs(1) - 1)
    def _():
        out_ref[...] = acc_ref[...]


# --------------------------------------------------------------------------- #
# Kernel 2: h1 = x @ W1_top' + agg @ W1_bot' + bias1'  (BN1 folded, no concat) #
# --------------------------------------------------------------------------- #
def _h1_kernel(x_ref, agg_ref, w1t_ref, w1b_ref, b1_ref, out_ref):
    h = jnp.dot(x_ref[...], w1t_ref[...], preferred_element_type=jnp.float32)
    h = h + jnp.dot(agg_ref[...], w1b_ref[...],
                    preferred_element_type=jnp.float32)
    out_ref[...] = h + b1_ref[...]


# --------------------------------------------------------------------------- #
# Kernel 3: y = relu(h1 * s2 + t2) @ W2 + b2   (BN2 as scale/shift, ReLU, FC)  #
# --------------------------------------------------------------------------- #
def _out_kernel(h1_ref, s2_ref, t2_ref, w2_ref, b2_ref, out_ref):
    h = jnp.maximum(h1_ref[...] * s2_ref[...] + t2_ref[...], 0.0)
    out_ref[...] = (jnp.dot(h, w2_ref[...], preferred_element_type=jnp.float32)
                    + b2_ref[...])


def dgnn_layer_forward(inp, adj, params, *, tm=128, tk=128):
    """Fused DGNNLayer forward (agg='cat', phi=identity, batch_norm=True)."""
    n, f = inp.shape
    h_dim = params["w1"].shape[1]
    o_dim = params["w2"].shape[1]

    tm = min(tm, n)
    tk = min(tk, n)
    assert n % tm == 0 and n % tk == 0, "node count must tile evenly"

    f_pad = _round_up(f)
    h_pad = _round_up(h_dim)
    o_pad = _round_up(o_dim)

    # ---- lane-dense, dtype-converted operands -------------------------------
    x_f32 = _pad_cols(inp.astype(jnp.float32), f_pad)         # (N, Fp) f32
    x_bf16 = x_f32.astype(jnp.bfloat16)                       # spmm operand
    adj_bf16 = adj.astype(jnp.bfloat16)                       # 0/1 -> exact

    # ---- stage 1: agg = adj @ x  (tiled + pipelined) -------------------------
    spmm = pl.pallas_call(
        _spmm_kernel,
        out_shape=jax.ShapeDtypeStruct((n, f_pad), jnp.float32),
        grid_spec=pltpu.PrefetchScalarGridSpec(
            num_scalar_prefetch=0,
            grid=(n // tm, n // tk),
            in_specs=[
                pl.BlockSpec((tm, tk), lambda i, k: (i, k)),        # adj slab
                pl.BlockSpec((tk, f_pad), lambda i, k: (k, 0)),     # x slab
            ],
            out_specs=pl.BlockSpec((tm, f_pad), lambda i, k: (i, 0)),
            scratch_shapes=[pltpu.VMEM((tm, f_pad), jnp.float32)],
        ),
        compiler_params=pltpu.CompilerParams(
            dimension_semantics=("parallel", "arbitrary"),
            vmem_limit_bytes=_VMEM_LIMIT,
        ),
        cost_estimate=pl.CostEstimate(
            flops=2 * n * n * f_pad,
            transcendentals=0,
            bytes_accessed=n * n * 2 + n * f_pad * 2 + n * f_pad * 4,
        ),
    )
    agg = spmm(adj_bf16, x_bf16)                               # (N, Fp) f32

    # ---- BN1 stats over ALL N rows; fold affine into W1 / bias1 --------------
    # TODO(synk): these O(N*C) reductions could be accumulated in-kernel across
    # an "arbitrary" row axis; kept wrapper-side (tiny vs. the N^2 spmm).
    g0, b0 = params["g0"], params["b0"]
    s_x, t_x = _bn_scale_shift(inp, g0[:, :f], b0[:, :f])
    s_a, t_a = _bn_scale_shift(agg[:, :f], g0[:, f:], b0[:, f:])

    w1_top, w1_bot = params["w1"][:f], params["w1"][f:]
    w1t_eff = _pad2(s_x.reshape(f, 1) * w1_top, f_pad, h_pad)
    w1b_eff = _pad2(s_a.reshape(f, 1) * w1_bot, f_pad, h_pad)
    b1_eff = _pad_cols(params["bias1"] + t_x @ w1_top + t_a @ w1_bot, h_pad)

    # ---- stage 2: h1 = x @ W1t' + agg @ W1b' + b1'  (row-tiled) --------------
    h1_call = pl.pallas_call(
        _h1_kernel,
        out_shape=jax.ShapeDtypeStruct((n, h_pad), jnp.float32),
        grid_spec=pltpu.PrefetchScalarGridSpec(
            num_scalar_prefetch=0,
            grid=(n // tm,),
            in_specs=[
                pl.BlockSpec((tm, f_pad), lambda i: (i, 0)),
                pl.BlockSpec((tm, f_pad), lambda i: (i, 0)),
                pl.BlockSpec((f_pad, h_pad), lambda i: (0, 0)),   # resident
                pl.BlockSpec((f_pad, h_pad), lambda i: (0, 0)),   # resident
                pl.BlockSpec((1, h_pad), lambda i: (0, 0)),       # resident
            ],
            out_specs=pl.BlockSpec((tm, h_pad), lambda i: (i, 0)),
        ),
        compiler_params=pltpu.CompilerParams(
            dimension_semantics=("parallel",),
            vmem_limit_bytes=_VMEM_LIMIT,
        ),
        cost_estimate=pl.CostEstimate(
            flops=4 * n * f_pad * h_pad,
            transcendentals=0,
            bytes_accessed=(2 * n * f_pad + 2 * f_pad * h_pad + n * h_pad) * 4,
        ),
    )
    h1 = h1_call(x_f32, agg, w1t_eff, w1b_eff, b1_eff)          # (N, Hp) f32

    # ---- BN2 stats over ALL N rows -> per-column scale/shift ------------------
    s2, t2 = _bn_scale_shift(h1[:, :h_dim], params["g1"], params["b1"])
    s2p = _pad_cols(s2, h_pad)
    t2p = _pad_cols(t2, h_pad)
    w2_eff = _pad2(params["w2"], h_pad, o_pad)
    b2_eff = _pad_cols(params["bias2"], o_pad)

    # ---- stage 3: y = relu(h1*s2 + t2) @ W2 + b2  (row-tiled, lane-dense) ----
    out_call = pl.pallas_call(
        _out_kernel,
        out_shape=jax.ShapeDtypeStruct((n, o_pad), jnp.float32),
        grid_spec=pltpu.PrefetchScalarGridSpec(
            num_scalar_prefetch=0,
            grid=(n // tm,),
            in_specs=[
                pl.BlockSpec((tm, h_pad), lambda i: (i, 0)),
                pl.BlockSpec((1, h_pad), lambda i: (0, 0)),       # resident
                pl.BlockSpec((1, h_pad), lambda i: (0, 0)),       # resident
                pl.BlockSpec((h_pad, o_pad), lambda i: (0, 0)),   # resident
                pl.BlockSpec((1, o_pad), lambda i: (0, 0)),       # resident
            ],
            out_specs=pl.BlockSpec((tm, o_pad), lambda i: (i, 0)),
        ),
        compiler_params=pltpu.CompilerParams(
            dimension_semantics=("parallel",),
            vmem_limit_bytes=_VMEM_LIMIT,
        ),
        cost_estimate=pl.CostEstimate(
            flops=2 * n * h_pad * o_pad,
            transcendentals=0,
            bytes_accessed=(n * h_pad + h_pad * o_pad + n * o_pad) * 4,
        ),
    )
    y_pad = out_call(h1, s2p, t2p, w2_eff, b2_eff)              # (N, Op) f32
    return y_pad[:, :o_dim]


# --------------------------------------------------------------------------- #
# Parameters / reference                                                       #
# --------------------------------------------------------------------------- #
def init_params(key, in_features, phi_features, hidden, out_features):
    """Parameter shapes matching the module; Linear weights stored transposed
    as (in_dim, out_dim)."""
    cat_dim = in_features + phi_features
    k1, k2, k3, k4 = jax.random.split(key, 4)
    return {
        "g0": jnp.ones((1, cat_dim), jnp.float32),
        "b0": jnp.zeros((1, cat_dim), jnp.float32),
        "w1": 0.1 * jax.random.normal(k1, (cat_dim, hidden), jnp.float32),
        "bias1": 0.1 * jax.random.normal(k2, (1, hidden), jnp.float32),
        "g1": jnp.ones((1, hidden), jnp.float32),
        "b1": jnp.zeros((1, hidden), jnp.float32),
        "w2": 0.1 * jax.random.normal(k3, (hidden, out_features), jnp.float32),
        "bias2": 0.1 * jax.random.normal(k4, (1, out_features), jnp.float32),
    }


def _batchnorm_train(h, gamma, beta):
    mean = jnp.mean(h, axis=0, keepdims=True)
    var = jnp.var(h, axis=0, keepdims=True)
    return (h - mean) * jax.lax.rsqrt(var + _EPS) * gamma + beta


def reference_forward(inp, adj, params):
    """Pure-JAX f32 reference of the PyTorch forward."""
    out = adj @ inp                                   # phi = identity, spmm
    h = jnp.concatenate([inp, out], axis=1)           # agg == 'cat'
    h = _batchnorm_train(h, params["g0"], params["b0"])
    h = h @ params["w1"] + params["bias1"]
    h = _batchnorm_train(h, params["g1"], params["b1"])
    h = jnp.maximum(h, 0.0)
    return h @ params["w2"] + params["bias2"]


if __name__ == "__main__":
    N = 256                    # nodes (2x2 spmm grid at 128x128 tiles)
    IN_FEATURES = 16
    PHI_FEATURES = 16          # phi = identity -> phi_features == in_features
    HIDDEN = 32
    OUT_FEATURES = 16          # encoder out_dims = [HIDDEN, OUT_FEATURES]

    key = jax.random.PRNGKey(0)
    k_inp, k_adj, k_par = jax.random.split(key, 3)

    inp = jax.random.normal(k_inp, (N, IN_FEATURES), jnp.float32)
    adj = (jax.random.uniform(k_adj, (N, N)) < 0.3).astype(jnp.float32)
    params = init_params(k_par, IN_FEATURES, PHI_FEATURES, HIDDEN, OUT_FEATURES)

    y = dgnn_layer_forward(inp, adj, params)
    jax.block_until_ready(y)

    y_ref = reference_forward(inp, adj, params)
    assert y.shape == (N, OUT_FEATURES)
    # bf16 operands on the adj@x MXU path introduce ~1e-2-level deviations vs.
    # the f32 reference (adj itself is exact in bf16); validated tolerance:
    assert jnp.allclose(y, y_ref, atol=5e-2, rtol=5e-2), "mismatch vs reference"

    print("KERNEL_OK")
</pallas_src>

<mosaic_0001>
module attributes {stable_mosaic.version = 11 : i64} {
  func.func @_spmm_kernel(%arg0: i32, %arg1: i32, %arg2: memref<128x128xbf16, #tpu.memory_space<vmem>>, %arg3: memref<128x128xbf16, #tpu.memory_space<vmem>>, %arg4: memref<128x128xf32, #tpu.memory_space<vmem>>, %arg5: memref<128x128xf32, #tpu.memory_space<vmem>>) attributes {dimension_semantics = [#tpu.dimension_semantics<parallel>, #tpu.dimension_semantics<arbitrary>], iteration_bounds = array<i64: 2, 2>, scalar_prefetch = 0 : i64, scratch_operands = 1 : i64, tpu.core_type = #tpu.core_type<tc>, window_params = [{transform_indices = @transform_0, window_bounds = array<i64: 128, 128>}, {transform_indices = @transform_1, window_bounds = array<i64: 128, 128>}, {transform_indices = @transform_2, window_bounds = array<i64: 128, 128>}]} {
    %c0_i32 = arith.constant 0 : i32
    %0 = arith.cmpi eq, %arg1, %c0_i32 : i32
    %1 = arith.extui %0 : i1 to i32
    %c0_i32_0 = arith.constant 0 : i32
    %2 = arith.cmpi ne, %1, %c0_i32_0 : i32
    scf.if %2 {
      %cst_9 = arith.constant 0.000000e+00 : f32
      %12 = vector.broadcast %cst_9 : f32 to vector<128x128xf32>
      %c0_10 = arith.constant 0 : index
      %c0_11 = arith.constant 0 : index
      %13 = vector.load %arg5[%c0_10, %c0_11] : memref<128x128xf32, #tpu.memory_space<vmem>>, vector<128x128xf32>
      tpu.vector_store %arg5[%c0_10, %c0_11], %12 {strides = array<i32>} : memref<128x128xf32, #tpu.memory_space<vmem>>, vector<128x128xf32>,
    } else {
    }
    %c0 = arith.constant 0 : index
    %c0_1 = arith.constant 0 : index
    %3 = vector.load %arg5[%c0, %c0_1] : memref<128x128xf32, #tpu.memory_space<vmem>>, vector<128x128xf32>
    %c0_2 = arith.constant 0 : index
    %c0_3 = arith.constant 0 : index
    %4 = vector.load %arg2[%c0_2, %c0_3] : memref<128x128xbf16, #tpu.memory_space<vmem>>, vector<128x128xbf16>
    %c0_4 = arith.constant 0 : index
    %c0_5 = arith.constant 0 : index
    %5 = vector.load %arg3[%c0_4, %c0_5] : memref<128x128xbf16, #tpu.memory_space<vmem>>, vector<128x128xbf16>
    %cst = arith.constant dense<0.000000e+00> : vector<128x128xf32>
    %6 = tpu.matmul %4, %5, %cst {dimension_numbers = #tpu.dot_dimension_numbers<[1], [0], [0], [1], [0, 0, 1, 1], [], []>} : vector<128x128xbf16>, vector<128x128xbf16>, vector<128x128xf32> -> vector<128x128xf32>
    %7 = arith.addf %3, %6 : vector<128x128xf32>
    %c0_6 = arith.constant 0 : index
    %c0_7 = arith.constant 0 : index
    %8 = vector.load %arg5[%c0_6, %c0_7] : memref<128x128xf32, #tpu.memory_space<vmem>>, vector<128x128xf32>
    tpu.vector_store %arg5[%c0_6, %c0_7], %7 {strides = array<i32>} : memref<128x128xf32, #tpu.memory_space<vmem>>, vector<128x128xf32>,
    %c1_i32 = arith.constant 1 : i32
    %9 = arith.cmpi eq, %arg1, %c1_i32 : i32
    %10 = arith.extui %9 : i1 to i32
    %c0_i32_8 = arith.constant 0 : i32
    %11 = arith.cmpi ne, %10, %c0_i32_8 : i32
    scf.if %11 {
      %c0_9 = arith.constant 0 : index
      %c0_10 = arith.constant 0 : index
      %12 = vector.load %arg5[%c0_9, %c0_10] : memref<128x128xf32, #tpu.memory_space<vmem>>, vector<128x128xf32>
      %c0_11 = arith.constant 0 : index
      %c0_12 = arith.constant 0 : index
      %13 = vector.load %arg4[%c0_11, %c0_12] : memref<128x128xf32, #tpu.memory_space<vmem>>, vector<128x128xf32>
      tpu.vector_store %arg4[%c0_11, %c0_12], %12 {strides = array<i32>} : memref<128x128xf32, #tpu.memory_space<vmem>>, vector<128x128xf32>,
    } else {
    }
    return
  }
  func.func @transform_0(%arg0: i32, %arg1: i32) -> (i32, i32) {
    %c0_i32 = arith.constant 0 : i32
    return %arg0, %arg1 : i32, i32
  }
  func.func @transform_1(%arg0: i32, %arg1: i32) -> (i32, i32) {
    %c0_i32 = arith.constant 0 : i32
    %c0_i32_0 = arith.constant 0 : i32
    return %arg1, %c0_i32 : i32, i32
  }
  func.func @transform_2(%arg0: i32, %arg1: i32) -> (i32, i32) {
    %c0_i32 = arith.constant 0 : i32
    %c0_i32_0 = arith.constant 0 : i32
    return %arg0, %c0_i32 : i32, i32
  }
}

</mosaic_0001>

<bundles_post_ra>
// kernel: tpu_custom_call.1
= control target key start
LH: loop header
LB: loop body
LE: loop exit
PB: predicated region body
PF: predicated region fallthrough
CT: control target
= control target key end

     0   :  { %s1491_s0 = inlined_call_operand.hbm [shape: bf16[256,256], index: 0, kind: input, shape index: {}]   ;;  %s1492_s1 = inlined_call_operand.hbm [shape: bf16[256,128], index: 1, kind: input, shape index: {}]   ;;  %s1493_s2 = inlined_call_operand.hbm [shape: f32[256,128], index: 2, kind: output, shape index: {}]  }
   0x1   :  { %1500 = sst [smem:[#allocation17_spill]] %s1491_s0 }
   0x2   :  { %1501 = sst [smem:[#allocation18_spill]] %s1492_s1 }
   0x3   :  { %1502 = sst [smem:[#allocation19_spill]] %s1493_s2 }
   0x4   :  { %7 = vsyncpa [#allocation4], 0 }
   0x5   :  { %9 = vsyncpa [#allocation4 + $0x1], 0 }
   0x6   :  { %10 = vsyncpa [#allocation7], 0 }
   0x7   :  { %12 = vsyncpa [#allocation7 + $0x1], 0 }
   0x8   :  { %13 = vsyncpa [#allocation5], 0 }
   0x9   :  { %15 = vsyncpa [#allocation5 + $0x1], 0  ;;  %s1162_s9 = smov 0   ;;  %s1164_s10 = smov 0  }
   0xa   :  { %s1166_s11 = smov 0   ;;  %s1168_s12 = smov 0  }
   0xb   :  { %s1170_s13 = smov 0   ;;  %s1172_s14 = smov 0  }
   0xc   :  { %s1174_s15 = smov 0   ;;  %s1176_s16 = smov 0  }
   0xd   :  { %s1178_s17 = smov 0   ;;  %s1180_s18 = smov 0  }
   0xe   :  { %s1182_s19 = smov 0   ;;  %s1184_s20 = smov 0  }
   0xf   :  { %s1186_s21 = smov 0   ;;  %s1188_s22 = smov 0  }
  0x10 LB: > { %1503 = sst [smem:[#allocation12_spill]] %s1084_s9  ;;  %s30_s23 = sadd.s32 1, %s1128_s20  ;;  %s1136_s22 = sphi %s1188_s22, %s21_s22   ;;  %s1132_s21 = sphi %s1186_s21, %s1543_s21   ;;  %s1128_s20 = sphi %s1184_s20, %s1542_s20   ;;  %s1124_s19 = sphi %s1182_s19, %s1541_s19   ;;  %s1120_s18 = sphi %s1180_s18, %s1540_s18   ;;  %s1116_s17 = sphi %s1178_s17, %s1539_s17   ;;  %s1112_s16 = sphi %s1176_s16, %s1538_s16   ;;  %s1108_s15 = sphi %s1174_s15, %s1537_s15   ;;  %s1104_s14 = sphi %s1172_s14, %s1536_s14   ;;  %s1100_s13 = sphi %s1170_s13, %s1535_s13   ;;  %s1096_s12 = sphi %s1168_s12, %s1534_s12   ;;  %s1092_s11 = sphi %s1166_s11, %s1533_s11   ;;  %s1088_s10 = sphi %s1164_s10, %s1532_s10   ;;  %s1084_s9 = sphi %s1162_s9, %s1531_s9  }
  0x11   : > { %1504 = sst [smem:[#allocation13_spill]] %s1120_s18  ;;  %s33_s24 = sadd.s32 1, %s1132_s21 }
  0x12   : > { %1505 = sst [smem:[#allocation14_spill]] %s1124_s19  ;;  %p31_p0 = scmp.ge.s32.totalorder %s30_s23, 2 }
  0x13   : > { %s42_s25 = sadd.s32 1, %s1116_s17  ;;  %p49_p1 = scmp.ne.s32.totalorder %s1116_s17, %s1112_s16 }
  0x14   : > { %p50_p2 = scmp.eq.s32.totalorder %s1136_s22, 0  ;;  %s1545_s23 = smov (%p31_p0, %s30_s23), 0 }
  0x15   : > { %1506 = sst [smem:[#allocation15_spill]] %s1545_s23  ;;  %s1547_s24 = smov (!%p31_p0, %s33_s24), %s1132_s21 }
  0x16   : > { %s1243_s26 = ssub.s32 %s1128_s20, %s1545_s23  ;;  %p1247_p3 = por %p50_p2, %p49_p1 }
  0x17   : > { %p35_p4 = scmp.ge.s32.totalorder %s1547_s24, 2  ;;  %p55_p5 = scmp.ne.s32.totalorder %s1112_s16, %s1108_s15 }
  0x18   : > { %p66_p6 = scmp.eq.s32.totalorder %s1243_s26, 0  ;;  %s94_s28 = sadd.s32 1, %s1092_s11 }
  0x19   : > { %s1549_s24 = smov (%p35_p4, %s1547_s24), 0  ;;  %p1496_p7 = scmp.lt.s32.totalorder %s1136_s22, 4 }
  0x1a   : > { %1508 = sst [smem:[#allocation16_spill]] %s1549_s24  ;;  %s37_s29 = ssub.s32 %s1132_s21, %s1549_s24 }
  0x1b   : > { %s131_s30 = sand.u32 1, %s1116_s17   ;;  %s39_s3 = sor.u32 %s1243_s26, %s37_s29 }
  0x1c   : > { %p92_p8 = scmp.eq.s32.totalorder %s37_s29, 0  ;;  %p40_p9 = scmp.eq.s32.totalorder %s39_s3, 0 }
  0x1d   : > { %s678_s6 = sshll.u32 %s131_s30, 6  ;;  %s712_s7 = sshll.u32 %s1132_s21, 5 }
  0x1e   : > { %s1263_s4 = scalar_select %p92_p8, %s1092_s11, %s94_s28  }
  0x1f   : > { %s1266_s5 = scalar_select %p40_p9, %s1116_s17, %s42_s25  }
  0x20   : > { %s141_s8 = sadd.s32 %s1128_s20, %s712_s7  ;;  %s135_s2 = scalar_lea.vmem [#allocation3], %s678_s6 }
  0x21   : > { %s681_s23 = sshll.u32 %s141_s8, 6  ;;  %s144_s19 = sshll.u32 %s135_s2, 4  ;;  %s145_s19 = int_to_ptr.vmem [resolvable:$true] %s144_s19 }
  0x22   : > { %s1509_s0 = sld [smem:[#allocation17_spill]]  ;;  %p1277_p10 = pnand %p1496_p7, %p1247_p3 }
  0x23   : > { %p685_p11 = scmp.ge.s32.totalorder %s1136_s22, 1  ;;  %s132_s25 = scalar_lea.sflag [#allocation4], %s131_s30 }
  0x24   : > { %p934_p12 = pneg %p1277_p10  ;;  %s945_s28 = scalar_lea.vmem %s145_s19, 1024 }
  0x25   : > { %p946_p13 = scmp.ne.s32.totalorder %s145_s19, %s945_s28  ;;  %s1138_s2 = smov [#allocation3]  }
  0x26   : > { %s950_s3 = sshll.u32 %s1138_s2, 4  ;;  %s951_s3 = int_to_ptr.vmem [resolvable:$false] %s950_s3 }
  0x27   : > { %p948_p0 = pnand %p946_p13, %p934_p12  ;;  %s952_s1 = scalar_lea.vmem %s951_s3, 2048 }
  0x28   : > { %s143_s9 = scalar_lea.hbm %s1509_s0, %s681_s23  ;;  %p953_p4 = scmp.lt.s32.totalorder %s145_s19, %s951_s3 }
  0x29   : > { %p949_p1 = pneg %p948_p0  ;;  %p954_p8 = scmp.lt.s32.totalorder %s952_s1, %s945_s28 }
  0x2b   : > { %p955_p9 = por %p954_p8, %p953_p4 }
  0x2d   : > { %p956_p3 = pnand %p955_p9, %p949_p1 }
  0x2f   : > { %959 = shalt.err (!%p956_p3)
}
  0x30   : > { %s1139_s18 = smov 128   ;;  %s1497_s23 = smov 64  }
  0x31   : > { %s1498_s27 = smov 4   ;;  %s1511_s30 = sld [smem:[#allocation12_spill]] }
  0x32   : > { %788 = dma.hbm_to_vmem [thread:$0]  (!%p1277_p10), %s143_s9, 1024, %s145_s19, %s132_s25, %s1139_s18, %s1497_s23, %s1498_s27  }
  0x33   : > { %p173_p12 = scmp.lt.s32.totalorder %s1136_s22, 5  ;;  %s674_s7 = sadd.s32 4294967295, %s1136_s22  }
  0x34   : > { %s675_s8 = sadd.s32 4294967294, %s1136_s22   ;;  %p56_p0 = scmp.eq.s32.totalorder %s674_s7, 0 }
  0x35   : > { %p1291_p13 = pnand %p685_p11, %p173_p12  ;;  %s68_s28 = sadd.s32 1, %s1104_s14 }
  0x36   : > { %s1301_s2 = scalar_select %p66_p6, %s1104_s14, %s68_s28  }
  0x37   : > { %p1306_p1 = por %p56_p0, %p55_p5  ;;  %p75_p10 = scmp.ne.s32.totalorder %s1104_s14, %s1100_s13 }
  0x38   : > { %p81_p11 = scmp.ne.s32.totalorder %s1100_s13, %s1096_s12  ;;  %p104_p4 = scmp.ne.s32.totalorder %s1092_s11, %s1088_s10 }
  0x39   : > { %p77_p8 = por %p75_p10, %p50_p2  ;;  %p105_p9 = scmp.eq.s32.totalorder %s674_s7, 3 }
  0x3a   : > { %p1318_p3 = por %p81_p11, %p56_p0  ;;  %p110_p12 = scmp.ne.s32.totalorder %s1088_s10, %s1511_s30 }
  0x3b   : > { %p1324_p7 = por %p105_p9, %p104_p4  ;;  %p111_p6 = scmp.eq.s32.totalorder %s675_s8, 3 }
  0x3c   : > { %s154_s15 = sand.u32 1, %s1104_s14   ;;  %s713_s26 = sshll.u32 %s1128_s20, 10 }
  0x3d   : > { %p1330_p5 = por %p111_p6, %p110_p12  ;;  %s682_s12 = sshll.u32 %s154_s15, 6 }
  0x3e   : > { %s1517_s18 = sld [smem:[#allocation18_spill]]  ;;  %p1518_p2 = scmp.lt.s32.totalorder %s1136_s22, 4 }
  0x3f   : > { %s158_s30 = scalar_lea.vmem [#allocation6], %s682_s12  ;;  %s155_s8 = scalar_lea.sflag [#allocation7], %s154_s15 }
  0x40   : > { %p1339_p0 = pnand %p1518_p2, %p77_p8  ;;  %s165_s23 = sshll.u32 %s158_s30, 4  ;;  %s166_s23 = int_to_ptr.vmem [resolvable:$true] %s165_s23 }
  0x41   : > { %s973_s27 = scalar_lea.vmem %s166_s23, 1024  ;;  %s1142_s0 = smov [#allocation6]  }
  0x42   : > { %p962_p10 = pneg %p1339_p0  ;;  %p974_p11 = scmp.ne.s32.totalorder %s166_s23, %s973_s27 }
  0x43   : > { %s978_s24 = sshll.u32 %s1142_s0, 4  ;;  %s979_s24 = int_to_ptr.vmem [resolvable:$false] %s978_s24 }
  0x44   : > { %s164_s7 = scalar_lea.hbm %s1517_s18, %s713_s26  ;;  %p976_p4 = pnand %p974_p11, %p962_p10 }
  0x45   : > { %s980_s26 = scalar_lea.vmem %s979_s24, 2048  ;;  %p981_p12 = scmp.lt.s32.totalorder %s166_s23, %s979_s24 }
  0x46   : > { %p977_p9 = pneg %p976_p4  ;;  %p982_p8 = scmp.lt.s32.totalorder %s980_s26, %s973_s27 }
  0x48   : > { %p983_p6 = por %p982_p8, %p981_p12 }
  0x4a   : > { %p984_p2 = pnand %p983_p6, %p977_p9 }
  0x4c   : > { %987 = shalt.err (!%p984_p2)
}
  0x4d   : > { %s1520_s12 = smov 4   ;;  %s1521_s3 = smov 64  }
  0x4e   : > { %791 = dma.hbm_to_vmem [thread:$0]  (!%p1339_p0), %s164_s7, 1024, %s166_s23, %s155_s8, %s1521_s3, %s1521_s3, %s1520_s12  }
  0x4f   : > { %177 = sbr.rel (%p1291_p13) target bundleno = 388 (0x184), region = 28  ;;  %s179_s15 = sand.u32 (!%p1291_p13), 1, %s1112_s16  }
  0x50   : > { %s686_s0 = sshll.u32 (!%p1291_p13), %s179_s15, 6  ;;  %s180_s1 = scalar_lea.sflag (!%p1291_p13), [#allocation4], %s179_s15 }
  0x51   : > { %s1353_s18 = scalar_lea.vmem (!%p1291_p13), [#allocation3], %s686_s0 }
  0x54   : > { %1071 = dma.done.wait (%p1306_p1), %s180_s1, 1024  }
  0x55   : > { %1073 = vsyncadd (%p1306_p1), %s180_s1, 4294966272  ;;  %s188_s24 = sand.u32 1, %s1100_s13  }
  0x56   : > { %s687_s27 = sshll.u32 %s188_s24, 6  ;;  %s189_s23 = scalar_lea.sflag [#allocation7], %s188_s24 }
  0x57   : > { %s1360_s7 = scalar_lea.vmem [#allocation6], %s687_s27 }
  0x58   : > { %1075 = dma.done.wait (%p1318_p3), %s189_s23, 1024  }
  0x59   : > { %1077 = vsyncadd (%p1318_p3), %s189_s23, 4294966272  ;;  %s215_s6 = sand.u32 1, %s1088_s10   ;;  %s1522_s29 = sld [smem:[#allocation13_spill]] }
  0x5a   : > { %s688_s28 = sshll.u32 %s215_s6, 7 }
  0x5b   : > { %s1369_s30 = scalar_lea.vmem [#allocation8], %s688_s28 }
  0x5f   : > { %p689_p13 = scmp.ne.s32.totalorder %s1522_s29, 0 }
  0x61   : > { %225 = sbr.rel (%p689_p13) target bundleno = 111 (0x6f), region = 40 }
  0x66   : > { %v1143_v0 = vmov 0.0  }
  0x67   : > { %226 = vst [vmem:[#allocation2 + $0x30] sm:$0xff] %v1143_v0  ;;  %227 = vst [vmem:[#allocation2] sm:$0xff] %v1143_v0 }
  0x68   : > { %228 = vst [vmem:[#allocation2 + $0x58] sm:$0xff] %v1143_v0  ;;  %229 = vst [vmem:[#allocation2 + $0x18] sm:$0xff] %v1143_v0 }
  0x69   : > { %230 = vst [vmem:[#allocation2 + $0x50] sm:$0xff] %v1143_v0  ;;  %231 = vst [vmem:[#allocation2 + $0x68] sm:$0xff] %v1143_v0 }
  0x6a   : > { %232 = vst [vmem:[#allocation2 + $0x8] sm:$0xff] %v1143_v0  ;;  %233 = vst [vmem:[#allocation2 + $0x48] sm:$0xff] %v1143_v0 }
  0x6b   : > { %234 = vst [vmem:[#allocation2 + $0x40] sm:$0xff] %v1143_v0  ;;  %235 = vst [vmem:[#allocation2 + $0x20] sm:$0xff] %v1143_v0 }
  0x6c   : > { %236 = vst [vmem:[#allocation2 + $0x10] sm:$0xff] %v1143_v0  ;;  %237 = vst [vmem:[#allocation2 + $0x38] sm:$0xff] %v1143_v0 }
  0x6d   : > { %238 = vst [vmem:[#allocation2 + $0x60] sm:$0xff] %v1143_v0  ;;  %239 = vst [vmem:[#allocation2 + $0x70] sm:$0xff] %v1143_v0 }
  0x6e   : > { %240 = vst [vmem:[#allocation2 + $0x78] sm:$0xff] %v1143_v0  ;;  %241 = vst [vmem:[#allocation2 + $0x28] sm:$0xff] %v1143_v0 }
  0x6f PF: > { %v916_v1 = vld [vmem:[%s1360_s7 + $0x38] sm:$0xff]   ;;  %v917_v2 = vld [vmem:[%s1360_s7 + $0x30] sm:$0xff]   ;;  %v918_v3 = vld [vmem:[%s1360_s7 + $0x28] sm:$0xff]   ;;  %s1523_s9 = sld [smem:[#allocation13_spill]] }
  0x70   : > { %731 = vmatprep.subr.bf16.mxu0 %v916_v1  ;;  %763 = vmatprep.subr.bf16.mxu1 %v916_v1  ;;  %v919_v4 = vld [vmem:[%s1360_s7 + $0x20] sm:$0xff]   ;;  %v920_v7 = vld [vmem:[%s1360_s7 + $0x18] sm:$0xff]   ;;  %v921_v8 = vld [vmem:[%s1360_s7 + $0x10] sm:$0xff]  }
  0x71   : > { %732 = vmatpush3.bf16.msra.mxu0 %v916_v1  ;;  %771 = vmatpush3.bf16.msra.mxu1 %v916_v1  ;;  %v924_v5 = vld [vmem:[%s1353_s18] sm:$0xff]   ;;  %v922_v9 = vld [vmem:[%s1360_s7 + $0x8] sm:$0xff]   ;;  %v928_v13 = vld [vmem:[%s1353_s18 + $0x10] sm:$0xff]  }
  0x72   : > { %733 = vmatprep.subr.bf16.mxu0 %v917_v2  ;;  %764 = vmatprep.subr.bf16.mxu1 %v917_v2  ;;  %v925_v6 = vld [vmem:[%s1353_s18 + $0x20] sm:$0xff]   ;;  %v926_v11 = vld [vmem:[%s1353_s18 + $0x8] sm:$0xff]   ;;  %v929_v14 = vld [vmem:[%s1353_s18 + $0x30] sm:$0xff]  }
  0x73   : > { %747 = vmatprep.mubr.bf16.mxu0 %v924_v5  ;;  %755 = vmatprep.mubr.bf16.mxu1 %v925_v6  ;;  %v923_v10 = vld [vmem:[%s1360_s7] sm:$0xff]   ;;  %v927_v12 = vld [vmem:[%s1353_s18 + $0x28] sm:$0xff]   ;;  %v930_v15 = vld [vmem:[%s1353_s18 + $0x18] sm:$0xff]  }
  0x74   : > { %v931_v16 = vld [vmem:[%s1353_s18 + $0x38] sm:$0xff]   ;;  %v252_v18 = vld [vmem:[#allocation2 + $0x10] sm:$0xff]  ;;  %v250_v22 = vld [vmem:[#allocation2 + $0x40] sm:$0xff] }
  0x75   : > { %734 = vmatpush3.bf16.msra.mxu0 %v917_v2  ;;  %772 = vmatpush3.bf16.msra.mxu1 %v917_v2  ;;  %v244_v17 = vld [vmem:[#allocation2 + $0x58] sm:$0xff]  ;;  %v242_v21 = vld [vmem:[#allocation2 + $0x30] sm:$0xff]  ;;  %v243_v33 = vld [vmem:[#allocation2] sm:$0xff]  ;;  %p706_p1 = scmp.ne.s32.totalorder %s1523_s9, 1 }
  0x76   : > { %735 = vmatprep.subr.bf16.mxu0 %v918_v3  ;;  %765 = vmatprep.subr.bf16.mxu1 %v918_v3  ;;  %v245_v27 = vld [vmem:[#allocation2 + $0x18] sm:$0xff]  ;;  %v251_v34 = vld [vmem:[#allocation2 + $0x20] sm:$0xff]  ;;  %v248_v39 = vld [vmem:[#allocation2 + $0x8] sm:$0xff] }
  0x77   : > { %v253_v28 = vld [vmem:[#allocation2 + $0x38] sm:$0xff]  ;;  %v246_v45 = vld [vmem:[#allocation2 + $0x50] sm:$0xff]  ;;  %v254_v46 = vld [vmem:[#allocation2 + $0x60] sm:$0xff] }
  0x78   : > { %v256_v40 = vld [vmem:[#allocation2 + $0x78] sm:$0xff]  ;;  %v249_v51 = vld [vmem:[#allocation2 + $0x48] sm:$0xff]  ;;  %v255_v58 = vld [vmem:[#allocation2 + $0x70] sm:$0xff] }
  0x79   : > { %736 = vmatpush3.bf16.msra.mxu0 %v918_v3  ;;  %773 = vmatpush3.bf16.msra.mxu1 %v918_v3  ;;  %v257_v52 = vld [vmem:[#allocation2 + $0x28] sm:$0xff] }
  0x7a   : > { %737 = vmatprep.subr.bf16.mxu0 %v919_v4  ;;  %766 = vmatprep.subr.bf16.mxu1 %v919_v4  ;;  %v247_v57 = vld [vmem:[#allocation2 + $0x68] sm:$0xff] }
  0x7d   : > { %738 = vmatpush3.bf16.msra.mxu0 %v919_v4  ;;  %774 = vmatpush3.bf16.msra.mxu1 %v919_v4 }
  0x7e   : > { %739 = vmatprep.subr.bf16.mxu0 %v920_v7  ;;  %767 = vmatprep.subr.bf16.mxu1 %v920_v7 }
  0x81   : > { %740 = vmatpush3.bf16.msra.mxu0 %v920_v7  ;;  %775 = vmatpush3.bf16.msra.mxu1 %v920_v7 }
  0x82   : > { %741 = vmatprep.subr.bf16.mxu0 %v921_v8  ;;  %768 = vmatprep.subr.bf16.mxu1 %v921_v8 }
  0x85   : > { %742 = vmatpush3.bf16.msra.mxu0 %v921_v8  ;;  %776 = vmatpush3.bf16.msra.mxu1 %v921_v8 }
  0x86   : > { %743 = vmatprep.subr.bf16.mxu0 %v922_v9  ;;  %769 = vmatprep.subr.bf16.mxu1 %v922_v9 }
  0x89   : > { %744 = vmatpush3.bf16.msra.mxu0 %v922_v9  ;;  %777 = vmatpush3.bf16.msra.mxu1 %v922_v9 }
  0x8a   : > { %745 = vmatprep.subr.bf16.mxu0 %v923_v10  ;;  %770 = vmatprep.subr.bf16.mxu1 %v923_v10 }
  0x8d   : > { %746 = vmatpush3.bf16.msra.mxu0 %v923_v10  ;;  %778 = vmatpush3.bf16.msra.mxu1 %v923_v10 }
  0x90   : > { %748 = vmatmul.mubr.bf16.vlgmr.msra.gmra.mxu0 %v926_v11  ;;  %756 = vmatmul.mubr.bf16.vlgmr.msra.gmra.mxu1 %v927_v12 }
  0x91   : > { %751 = vmatprep.mubr.bf16.mxu0 %v928_v13  ;;  %759 = vmatprep.mubr.bf16.mxu1 %v929_v14 }
  0x98   : > { %752 = vmatmul.mubr.bf16.gmra.mxu0 %v930_v15  ;;  %760 = vmatmul.mubr.bf16.gmra.mxu1 %v931_v16 }
 0x150   : > { %v749_v19 = vpop.f32.mrf.mxu0  ;;  %v757_v20 = vpop.f32.mrf.mxu1 }
 0x151   : > { %v485_v23 = vadd.f32 %v749_v19, %v244_v17  ;;  %v493_v24 = vadd.f32 %v757_v20, %v252_v18 }
 0x152   : > { %v420_v25 = vpop.f32.mrf.mxu0  ;;  %v452_v26 = vpop.f32.mrf.mxu1 }
 0x153   : > { %501 = vst [vmem:[#allocation2 + $0x58] sm:$0xff] %v485_v23  ;;  %509 = vst [vmem:[#allocation2 + $0x10] sm:$0xff] %v493_v24  ;;  %v483_v29 = vadd.f32 %v420_v25, %v242_v21  ;;  %v491_v30 = vadd.f32 %v452_v26, %v250_v22 }
 0x154   : > { %v750_v31 = vpop.f32.mrf.mxu0  ;;  %v758_v32 = vpop.f32.mrf.mxu1 }
 0x155   : > { %499 = vst [vmem:[#allocation2 + $0x30] sm:$0xff] %v483_v29  ;;  %507 = vst [vmem:[#allocation2 + $0x40] sm:$0xff] %v491_v30  ;;  %v486_v35 = vadd.f32 %v750_v31, %v245_v27  ;;  %v494_v36 = vadd.f32 %v758_v32, %v253_v28 }
 0x156   : > { %v423_v37 = vpop.f32.mrf.mxu0  ;;  %v455_v38 = vpop.f32.mrf.mxu1 }
 0x157   : > { %502 = vst [vmem:[#allocation2 + $0x18] sm:$0xff] %v486_v35  ;;  %510 = vst [vmem:[#allocation2 + $0x38] sm:$0xff] %v494_v36  ;;  %v484_v41 = vadd.f32 %v423_v37, %v243_v33  ;;  %v492_v42 = vadd.f32 %v455_v38, %v251_v34 }
 0x158   : > { %v753_v43 = vpop.f32.mrf.mxu0  ;;  %v761_v44 = vpop.f32.mrf.mxu1 }
 0x159   : > { %500 = vst [vmem:[#allocation2] sm:$0xff] %v484_v41  ;;  %508 = vst [vmem:[#allocation2 + $0x20] sm:$0xff] %v492_v42  ;;  %v489_v47 = vadd.f32 %v753_v43, %v248_v39  ;;  %v497_v48 = vadd.f32 %v761_v44, %v256_v40 }
 0x15a   : > { %v436_v49 = vpop.f32.mrf.mxu0  ;;  %v468_v50 = vpop.f32.mrf.mxu1 }
 0x15b   : > { %505 = vst [vmem:[#allocation2 + $0x8] sm:$0xff] %v489_v47  ;;  %513 = vst [vmem:[#allocation2 + $0x78] sm:$0xff] %v497_v48  ;;  %v487_v53 = vadd.f32 %v436_v49, %v246_v45  ;;  %v495_v54 = vadd.f32 %v468_v50, %v254_v46 }
 0x15c   : > { %v754_v55 = vpop.f32.mrf.mxu0  ;;  %v762_v56 = vpop.f32.mrf.mxu1 }
 0x15d   : > { %503 = vst [vmem:[#allocation2 + $0x50] sm:$0xff] %v487_v53  ;;  %511 = vst [vmem:[#allocation2 + $0x60] sm:$0xff] %v495_v54  ;;  %v490_v59 = vadd.f32 %v754_v55, %v249_v51  ;;  %v498_v60 = vadd.f32 %v762_v56, %v257_v52  ;;  %518 = sbr.rel (%p706_p1) target bundleno = 363 (0x16b), region = 44 }
 0x15e   : > { %v439_v61 = vpop.f32.mrf.mxu0  ;;  %v471_v62 = vpop.f32.mrf.mxu1 }
 0x15f   : > { %506 = vst [vmem:[#allocation2 + $0x48] sm:$0xff] %v490_v59  ;;  %514 = vst [vmem:[#allocation2 + $0x28] sm:$0xff] %v498_v60  ;;  %v488_v63 = vadd.f32 %v439_v61, %v247_v57  ;;  %v496_v0 = vadd.f32 %v471_v62, %v255_v58 }
 0x161   : > { %504 = vst [vmem:[#allocation2 + $0x68] sm:$0xff] %v488_v63  ;;  %512 = vst [vmem:[#allocation2 + $0x70] sm:$0xff] %v496_v0 }
 0x162   : > { %v519_v1 = vld [vmem:[#allocation2 + $0x30] sm:$0xff]  ;;  %v520_v2 = vld [vmem:[#allocation2] sm:$0xff]  ;;  %v521_v3 = vld [vmem:[#allocation2 + $0x58] sm:$0xff] }
 0x163   : > { %535 = vst [vmem:[%s1369_s30] sm:$0xff] %v519_v1  ;;  %536 = vst [vmem:[%s1369_s30 + $0x8] sm:$0xff] %v520_v2  ;;  %v522_v4 = vld [vmem:[#allocation2 + $0x18] sm:$0xff]  ;;  %v525_v7 = vld [vmem:[#allocation2 + $0x8] sm:$0xff] }
 0x164   : > { %537 = vst [vmem:[%s1369_s30 + $0x10] sm:$0xff] %v521_v3  ;;  %v523_v5 = vld [vmem:[#allocation2 + $0x50] sm:$0xff]  ;;  %538 = vst [vmem:[%s1369_s30 + $0x18] sm:$0xff] %v522_v4  ;;  %v527_v9 = vld [vmem:[#allocation2 + $0x40] sm:$0xff] }
 0x165   : > { %539 = vst [vmem:[%s1369_s30 + $0x20] sm:$0xff] %v523_v5  ;;  %541 = vst [vmem:[%s1369_s30 + $0x30] sm:$0xff] %v525_v7  ;;  %v528_v10 = vld [vmem:[#allocation2 + $0x20] sm:$0xff]  ;;  %v529_v11 = vld [vmem:[#allocation2 + $0x10] sm:$0xff] }
 0x166   : > { %v526_v8 = vld [vmem:[#allocation2 + $0x48] sm:$0xff]  ;;  %543 = vst [vmem:[%s1369_s30 + $0x40] sm:$0xff] %v527_v9  ;;  %v530_v12 = vld [vmem:[#allocation2 + $0x38] sm:$0xff]  ;;  %544 = vst [vmem:[%s1369_s30 + $0x48] sm:$0xff] %v528_v10 }
 0x167   : > { %542 = vst [vmem:[%s1369_s30 + $0x38] sm:$0xff] %v526_v8  ;;  %545 = vst [vmem:[%s1369_s30 + $0x50] sm:$0xff] %v529_v11  ;;  %v531_v13 = vld [vmem:[#allocation2 + $0x60] sm:$0xff]  ;;  %v533_v15 = vld [vmem:[#allocation2 + $0x78] sm:$0xff] }
 0x168   : > { %v524_v6 = vld [vmem:[#allocation2 + $0x68] sm:$0xff]  ;;  %546 = vst [vmem:[%s1369_s30 + $0x58] sm:$0xff] %v530_v12  ;;  %v532_v14 = vld [vmem:[#allocation2 + $0x70] sm:$0xff]  ;;  %547 = vst [vmem:[%s1369_s30 + $0x60] sm:$0xff] %v531_v13 }
 0x169   : > { %540 = vst [vmem:[%s1369_s30 + $0x28] sm:$0xff] %v524_v6  ;;  %548 = vst [vmem:[%s1369_s30 + $0x68] sm:$0xff] %v532_v14  ;;  %v534_v16 = vld [vmem:[#allocation2 + $0x28] sm:$0xff] }
 0x16a   : > { %549 = vst [vmem:[%s1369_s30 + $0x70] sm:$0xff] %v533_v15  ;;  %550 = vst [vmem:[%s1369_s30 + $0x78] sm:$0xff] %v534_v16 }
 0x16b PF: > { %s1524_s8 = sld [smem:[#allocation14_spill]]  ;;  %s565_s18 = sshll.u32 %s1369_s30, 4  ;;  %s1412_s18 = int_to_ptr.vmem [resolvable:$true] %s565_s18 }
 0x16c   : > { %s1525_s15 = sld [smem:[#allocation19_spill]]  ;;  %s1416_s24 = scalar_lea.sflag [#allocation5], %s215_s6 }
 0x16d   : > { %s988_s27 = scalar_lea.vmem %s1412_s18, 2048  ;;  %s1144_s23 = smov [#allocation8]  }
 0x16e   : > { %p989_p3 = scmp.ne.s32.totalorder %s1412_s18, %s988_s27  ;;  %s992_s7 = sshll.u32 %s1144_s23, 4  ;;  %s993_s7 = int_to_ptr.vmem [resolvable:$false] %s992_s7 }
 0x16f   : > { %s994_s28 = scalar_lea.vmem %s993_s7, 4096  ;;  %p995_p11 = scmp.lt.s32.totalorder %s1412_s18, %s993_s7 }
 0x170   : > { %p990_p0 = pnand %p989_p3, %p1324_p7  ;;  %p996_p4 = scmp.lt.s32.totalorder %s994_s28, %s988_s27 }
 0x171   : > { %s714_s26 = sshll.u32 %s1524_s8, 11 }
 0x172   : > { %s1526_s0 = smov %s1525_s15  ;;  %s1409_s1 = scalar_lea.hbm %s1525_s15, %s714_s26 }
 0x173   : > { %p991_p10 = pneg %p990_p0  ;;  %p997_p9 = por %p996_p4, %p995_p11 }
 0x175   : > { %p998_p12 = pnand %p997_p9, %p991_p10 }
 0x177   : > { %1001 = shalt.err (!%p998_p12)
}
 0x178   : > { %s1002_s6 = scalar_lea.hbm %s1409_s1, 2048  ;;  %s1006_s9 = scalar_lea.hbm %s1526_s0, 4096 }
 0x179   : > { %p1003_p8 = scmp.ne.s32.totalorder %s1409_s1, %s1002_s6  ;;  %p1007_p13 = scmp.lt.s32.totalorder %s1409_s1, %s1526_s0 }
 0x17a   : > { %p1008_p1 = scmp.lt.s32.totalorder %s1006_s9, %s1002_s6 }
 0x17b   : > { %p1004_p6 = pnand %p1003_p8, %p1324_p7 }
 0x17c   : > { %p1009_p3 = por %p1008_p1, %p1007_p13 }
 0x17d   : > { %p1005_p2 = pneg %p1004_p6 }
 0x17f   : > { %p1010_p0 = pnand %p1009_p3, %p1005_p2 }
 0x181   : > { %1013 = shalt.err (!%p1010_p0)
}
 0x182   : > { %s1145_s12 = smov 128   ;;  %s1146_s3 = smov 8  }
 0x183   : > { %783 = dma.vmem_to_hbm [thread:$0]  (%p1324_p7), %s1412_s18, 2048, %s1409_s1, %s1416_s24, %s1145_s12, %s1145_s12, %s1146_s3  }
 0x184 PF: > { %s1527_s15 = sld [smem:[#allocation12_spill]]  ;;  %p797_p10 = scmp.ge.s32.totalorder %s1136_s22, 2 }
 0x186   : > { %p793_p11 = pnand %p797_p10, %p1330_p5 }
 0x188   : > { %p794_p4 = pneg %p793_p11 }
 0x18a   : > { %s580_s27 = sand.u32 1, %s1527_s15  }
 0x18b   : > { %s581_s23 = scalar_lea.sflag [#allocation5], %s580_s27 }
 0x18c   : > { %1079 = dma.done.wait (%p794_p4), %s581_s23, 2048  }
 0x18d   : > { %1081 = vsyncadd (%p794_p4), %s581_s23, 4294965248  ;;  %s21_s22 = sadd.s32 1, %s1136_s22   ;;  %s1529_s25 = sld [smem:[#allocation15_spill]] }
 0x18e   : > { %p1444_p9 = scmp.ge.s32.totalorder %s21_s22, 6   ;;  %s1530_s1 = sld [smem:[#allocation16_spill]] }
 0x18f   : > { %s1531_s9 = smov %s1088_s10  ;;  %s1532_s10 = smov %s1092_s11 }
 0x190   : > { %s1533_s11 = smov %s1263_s4  ;;  %s1534_s12 = smov %s1100_s13 }
 0x191   : > { %s1535_s13 = smov %s1104_s14  ;;  %s1536_s14 = smov %s1301_s2 }
 0x192   : > { %s1537_s15 = smov %s1112_s16  ;;  %s1538_s16 = smov %s1116_s17 }
 0x193   : > { %s1539_s17 = smov %s1266_s5  ;;  %s1540_s18 = smov %s1128_s20 }
 0x194   : > { %s1541_s19 = smov %s1132_s21  ;;  %s1542_s20 = smov %s1529_s25 }
 0x195   : > { %s1543_s21 = smov %s1530_s1  ;;  %20 = sbr.rel (!%p1444_p9) target bundleno = 16 (0x10), region = 94 }
 0x19a   :  { %586 = vsyncpa [#allocation4], 1 }
 0x19b   :  { %588 = vsyncpa [#allocation4 + $0x1], 1 }
 0x19c   :  { %589 = vsyncpa [#allocation7], 1 }
 0x19d   :  { %591 = vsyncpa [#allocation7 + $0x1], 1 }
 0x19e   :  { %592 = vsyncpa [#allocation5], 1 }
 0x19f   :  { %594 = vsyncpa [#allocation5 + $0x1], 1 }

</bundles_post_ra>
